<compile_context>
chip_gen: v7x
topology: tpu7x:2x2x1
jax: 0.10.0
libtpu: 0.0.40
codegen_flags: <defaults>
</compile_context>

<pallas_src>
import functools

import jax
import jax.numpy as jnp
from jax.experimental import pallas as pl
from jax.experimental.pallas import tpu as pltpu


def _round_up(x, m):
    return ((x + m - 1) // m) * m


def _cdiv(a, b):
    return -(-a // b)


def _choose_block_rows(total, nc, itemsize, target_tile_bytes=2 << 20):
    """Row-tile height: ~2 MiB of input per tile, rounded to a multiple of 8 sublanes."""
    c_pad = _round_up(nc, 128)            # lanes physically occupied per row in VMEM
    row_bytes = c_pad * itemsize
    br = max(8, (target_tile_bytes // row_bytes) // 8 * 8)
    return int(min(br, _round_up(total, 8)))


def _nll_sum_kernel(x_ref, t_ref, w_ref, out_ref, acc_ref, *,
                    total, block_rows, blocks_per_split):
    """Weighted NLL partial sum for one row tile, accumulated across the grid.

    x_ref : (BR, NC)        native-dtype log-probabilities tile
    t_ref : (BR, 1)   i32   target class per row
    w_ref : (1, NC)   f32   per-class weight (weight[0] = 0), VMEM-resident
    out   : (1,8,128) f32   per-split partial (-sum), scalar broadcast over one vreg
    acc   : (8, NC)   f32   per-split VMEM accumulator of per-class picks
    """
    s = pl.program_id(0)                  # row-split (TensorCore) index
    i = pl.program_id(1)                  # row-block step within this split

    @pl.when(i == 0)
    def _():
        acc_ref[...] = jnp.zeros_like(acc_ref)

    x = x_ref[...].astype(jnp.float32)    # upcast per tile (HBM streams native dtype)
    t = t_ref[...]                        # (BR, 1) int32
    br, nc = x.shape

    col_ids = jax.lax.broadcasted_iota(jnp.int32, (br, nc), 1)
    row_ids = jax.lax.broadcasted_iota(jnp.int32, (br, nc), 0)
    row_base = (s * blocks_per_split + i) * block_rows
    mask = (col_ids == t) & (row_base + row_ids < total)   # one-hot & ragged-tail mask
    picked = jnp.where(mask, x, 0.0)

    # Fold rows 8 at a time with plain vreg adds; lane/sublane reduce deferred to epilogue.
    acc_ref[...] += picked.reshape(br // 8, 8, nc).sum(axis=0)

    @pl.when(i == pl.num_programs(1) - 1)
    def _():
        # Weight applied once here (not in the hot loop); single final reduce.
        partial = -jnp.sum(acc_ref[...] * w_ref[...])
        out_ref[...] = jnp.broadcast_to(partial, out_ref.shape).astype(jnp.float32)


def sequence_criterion_loss(inputs, targets, weight, block_rows=None, num_splits=2):
    """inputs: (..., nc) log-probs; targets: (...) int; weight: (nc,). Returns scalar sum loss."""
    nc = inputs.shape[-1]
    total = int(targets.size)

    x = inputs.reshape(total, nc)                       # metadata-only reshape, native dtype
    t = targets.reshape(total, 1).astype(jnp.int32)
    w = weight.reshape(1, nc).astype(jnp.float32)

    if block_rows is None:
        block_rows = _choose_block_rows(total, nc, jnp.dtype(x.dtype).itemsize)
    br = max(8, _round_up(min(int(block_rows), _round_up(total, 8)), 8))

    n_blocks = _cdiv(total, br)                         # total row tiles
    inner = _cdiv(n_blocks, num_splits)                 # tiles per split (tail masked)
    last_blk = n_blocks - 1

    def row_map(s, i):
        # Clamp so overflow steps of the last split never index past the array;
        # their rows are fully masked in-kernel (row_base >= total).
        return (jnp.minimum(s * inner + i, last_blk), 0)

    kernel = functools.partial(_nll_sum_kernel, total=total, block_rows=br,
                               blocks_per_split=inner)

    # TODO(synk): for vocab-scale nc, switch to a class-tiled / target-gather design so
    # HBM traffic is ~N*128 lanes instead of N*nc (changes the roofline entirely).
    partials = pl.pallas_call(
        kernel,
        out_shape=jax.ShapeDtypeStruct((num_splits, 8, 128), jnp.float32),
        grid=(num_splits, inner),
        in_specs=[
            pl.BlockSpec((br, nc), row_map),            # row tiles pipeline HBM->VMEM
            pl.BlockSpec((br, 1), row_map),             # matching target tile
            pl.BlockSpec((1, nc), lambda s, i: (0, 0)),  # weights stay VMEM-resident
        ],
        out_specs=pl.BlockSpec((1, 8, 128), lambda s, i: (s, 0, 0)),
        scratch_shapes=[pltpu.VMEM((8, nc), jnp.float32)],
        compiler_params=pltpu.CompilerParams(
            dimension_semantics=("parallel", "arbitrary"),  # rows split across TCs (v7x)
            vmem_limit_bytes=32 * 1024 * 1024),
    )(x, t, w)

    return jnp.sum(partials[:, 0, 0])


def sequence_criterion(nc):
    """Module-equivalent: builds weight = ones(nc) with weight[0] = 0."""
    weight = jnp.ones((nc,), jnp.float32).at[0].set(0.0)

    def forward(inputs, targets):
        return sequence_criterion_loss(inputs, targets, weight)

    return forward


if __name__ == "__main__":
    def reference(inputs, targets, weight):
        nc = inputs.shape[-1]
        n = int(targets.size)
        x2 = inputs.reshape(n, nc).astype(jnp.float32)
        tf = targets.reshape(n)
        return -jnp.sum(weight[tf] * x2[jnp.arange(n), tf])

    key = jax.random.PRNGKey(0)
    k1, k2, k3, k4 = jax.random.split(key, 4)

    # Case 1: small shapes matching the module's usage (B, T, nc), log-softmax inputs.
    B, T, NC = 2, 8, 20
    inputs = jax.nn.log_softmax(jax.random.normal(k1, (B, T, NC), jnp.float32), axis=-1)
    targets = jax.random.randint(k2, (B, T), 0, NC, dtype=jnp.int32)   # includes class 0
    weight = jnp.ones((NC,), jnp.float32).at[0].set(0.0)
    ref = reference(inputs, targets, weight)

    crit = sequence_criterion(NC)
    loss = jax.block_until_ready(crit(inputs, targets))
    assert loss.shape == (), loss.shape
    assert bool(jnp.isfinite(loss))
    assert bool(jnp.allclose(loss, ref, rtol=1e-5, atol=1e-5)), (loss, ref)

    # Forced multi-tile grid: block_rows=8 -> 2 row tiles, one per split.
    loss2 = jax.block_until_ready(
        sequence_criterion_loss(inputs, targets, weight, block_rows=8))
    assert bool(jnp.allclose(loss2, ref, rtol=1e-5, atol=1e-5)), (loss2, ref)

    # Case 2: ragged row count, multi-step accumulation per split, bf16 streaming.
    B2, T2 = 4, 61                                      # total = 244, not a multiple of 16
    inputs2 = jax.nn.log_softmax(
        jax.random.normal(k3, (B2, T2, NC), jnp.float32), axis=-1).astype(jnp.bfloat16)
    targets2 = jax.random.randint(k4, (B2, T2), 0, NC, dtype=jnp.int32)
    loss3 = jax.block_until_ready(
        sequence_criterion_loss(inputs2, targets2, weight, block_rows=16))
    ref3 = reference(inputs2, targets2, weight)
    assert bool(jnp.allclose(loss3, ref3, rtol=1e-4, atol=1e-4)), (loss3, ref3)

    print("KERNEL_OK")
</pallas_src>

<mosaic_0001>
module attributes {stable_mosaic.version = 11 : i64} {
  func.func @_nll_sum_kernel(%arg0: i32, %arg1: i32, %arg2: memref<16x20xf32, #tpu.memory_space<vmem>>, %arg3: memref<16x1xi32, #tpu.memory_space<vmem>>, %arg4: memref<1x20xf32, #tpu.memory_space<vmem>>, %arg5: memref<1x8x128xf32, #tpu.memory_space<vmem>>, %arg6: memref<8x20xf32, #tpu.memory_space<vmem>>) attributes {dimension_semantics = [#tpu.dimension_semantics<parallel>, #tpu.dimension_semantics<arbitrary>], iteration_bounds = array<i64: 2, 1>, scalar_prefetch = 0 : i64, scratch_operands = 1 : i64, tpu.core_type = #tpu.core_type<tc>, window_params = [{transform_indices = @transform_0, window_bounds = array<i64: 16, 20>}, {transform_indices = @transform_1, window_bounds = array<i64: 16, 1>}, {pipeline_mode = #tpu.pipeline_mode<synchronous>, transform_indices = @transform_2, window_bounds = array<i64: 1, 20>}, {transform_indices = @transform_3, window_bounds = array<i64: 1, 8, 128>}]} {
    %c0_i32 = arith.constant 0 : i32
    %0 = arith.cmpi eq, %arg1, %c0_i32 : i32
    %1 = arith.extui %0 : i1 to i32
    %c0_i32_0 = arith.constant 0 : i32
    %2 = arith.cmpi ne, %1, %c0_i32_0 : i32
    scf.if %2 {
      %cst_12 = arith.constant 0.000000e+00 : f32
      %27 = vector.broadcast %cst_12 : f32 to vector<8x20xf32>
      %c0_13 = arith.constant 0 : index
      %c0_14 = arith.constant 0 : index
      %28 = vector.load %arg6[%c0_13, %c0_14] : memref<8x20xf32, #tpu.memory_space<vmem>>, vector<8x20xf32>
      tpu.vector_store %arg6[%c0_13, %c0_14], %27 {strides = array<i32>} : memref<8x20xf32, #tpu.memory_space<vmem>>, vector<8x20xf32>,
    } else {
    }
    %c0 = arith.constant 0 : index
    %c0_1 = arith.constant 0 : index
    %3 = vector.load %arg2[%c0, %c0_1] : memref<16x20xf32, #tpu.memory_space<vmem>>, vector<16x20xf32>
    %c0_2 = arith.constant 0 : index
    %c0_3 = arith.constant 0 : index
    %4 = vector.load %arg3[%c0_2, %c0_3] : memref<16x1xi32, #tpu.memory_space<vmem>>, vector<16x1xi32>
    %5 = tpu.iota {dimensions = array<i32: 1>} : vector<16x20xi32>
    %6 = tpu.iota {dimensions = array<i32: 0>} : vector<16x20xi32>
    %c1_i32 = arith.constant 1 : i32
    %7 = arith.muli %arg0, %c1_i32 : i32
    %8 = arith.addi %7, %arg1 : i32
    %c16_i32 = arith.constant 16 : i32
    %9 = arith.muli %8, %c16_i32 : i32
    %10 = vector.broadcast %4 : vector<16x1xi32> to vector<16x20xi32>
    %11 = arith.cmpi eq, %5, %10 : vector<16x20xi32>
    %12 = vector.broadcast %9 : i32 to vector<16x20xi32>
    %13 = arith.addi %12, %6 : vector<16x20xi32>
    %c16_i32_4 = arith.constant 16 : i32
    %14 = vector.broadcast %c16_i32_4 : i32 to vector<16x20xi32>
    %15 = arith.cmpi slt, %13, %14 : vector<16x20xi32>
    %16 = arith.andi %11, %15 : vector<16x20xi1>
    %cst = arith.constant 0.000000e+00 : f32
    %17 = vector.broadcast %cst : f32 to vector<16x20xf32>
    %18 = arith.select %16, %3, %17 : vector<16x20xi1>, vector<16x20xf32>
    %c0_5 = arith.constant 0 : index
    %c0_6 = arith.constant 0 : index
    %19 = vector.load %arg6[%c0_5, %c0_6] : memref<8x20xf32, #tpu.memory_space<vmem>>, vector<8x20xf32>
    %20 = vector.shape_cast %18 : vector<16x20xf32> to vector<2x8x20xf32>
    %cst_7 = arith.constant dense<0.000000e+00> : vector<8x20xf32>
    %21 = vector.multi_reduction <add>, %20, %cst_7 [0] : vector<2x8x20xf32> to vector<8x20xf32>
    %22 = arith.addf %19, %21 : vector<8x20xf32>
    %c0_8 = arith.constant 0 : index
    %c0_9 = arith.constant 0 : index
    %23 = vector.load %arg6[%c0_8, %c0_9] : memref<8x20xf32, #tpu.memory_space<vmem>>, vector<8x20xf32>
    tpu.vector_store %arg6[%c0_8, %c0_9], %22 {strides = array<i32>} : memref<8x20xf32, #tpu.memory_space<vmem>>, vector<8x20xf32>,
    %c0_i32_10 = arith.constant 0 : i32
    %24 = arith.cmpi eq, %arg1, %c0_i32_10 : i32
    %25 = arith.extui %24 : i1 to i32
    %c0_i32_11 = arith.constant 0 : i32
    %26 = arith.cmpi ne, %25, %c0_i32_11 : i32
    scf.if %26 {
      %c0_12 = arith.constant 0 : index
      %c0_13 = arith.constant 0 : index
      %27 = vector.load %arg6[%c0_12, %c0_13] : memref<8x20xf32, #tpu.memory_space<vmem>>, vector<8x20xf32>
      %c0_14 = arith.constant 0 : index
      %c0_15 = arith.constant 0 : index
      %28 = vector.load %arg4[%c0_14, %c0_15] : memref<1x20xf32, #tpu.memory_space<vmem>>, vector<1x20xf32>
      %29 = vector.broadcast %28 : vector<1x20xf32> to vector<8x20xf32>
      %30 = arith.mulf %27, %29 : vector<8x20xf32>
      %31 = vector.shape_cast %30 : vector<8x20xf32> to vector<1x8x20xf32>
      %cst_16 = arith.constant dense<0.000000e+00> : vector<1xf32>
      %32 = vector.multi_reduction <add>, %31, %cst_16 [1, 2] : vector<1x8x20xf32> to vector<1xf32>
      %33 = vector.shape_cast %32 : vector<1xf32> to vector<1x1x1xf32>
      %34 = vector.extract %33[0, 0, 0] : f32 from vector<1x1x1xf32>
      %cst_17 = arith.constant 0.000000e+00 : f32
      %35 = arith.subf %cst_17, %34 : f32
      %36 = vector.broadcast %35 : f32 to vector<1x8x128xf32>
      %c0_18 = arith.constant 0 : index
      %c0_19 = arith.constant 0 : index
      %c0_20 = arith.constant 0 : index
      %37 = vector.load %arg5[%c0_18, %c0_19, %c0_20] : memref<1x8x128xf32, #tpu.memory_space<vmem>>, vector<1x8x128xf32>
      tpu.vector_store %arg5[%c0_18, %c0_19, %c0_20], %36 {strides = array<i32>} : memref<1x8x128xf32, #tpu.memory_space<vmem>>, vector<1x8x128xf32>,
    } else {
    }
    return
  }
  func.func @transform_0(%arg0: i32, %arg1: i32) -> (i32, i32) {
    %c1_i32 = arith.constant 1 : i32
    %0 = arith.muli %arg0, %c1_i32 : i32
    %1 = arith.addi %0, %arg1 : i32
    %c0_i32 = arith.constant 0 : i32
    %2 = arith.minsi %1, %c0_i32 : i32
    %c0_i32_0 = arith.constant 0 : i32
    %c0_i32_1 = arith.constant 0 : i32
    return %2, %c0_i32_0 : i32, i32
  }
  func.func @transform_1(%arg0: i32, %arg1: i32) -> (i32, i32) {
    %c1_i32 = arith.constant 1 : i32
    %0 = arith.muli %arg0, %c1_i32 : i32
    %1 = arith.addi %0, %arg1 : i32
    %c0_i32 = arith.constant 0 : i32
    %2 = arith.minsi %1, %c0_i32 : i32
    %c0_i32_0 = arith.constant 0 : i32
    %c0_i32_1 = arith.constant 0 : i32
    return %2, %c0_i32_0 : i32, i32
  }
  func.func @transform_2(%arg0: i32, %arg1: i32) -> (i32, i32) {
    %c0_i32 = arith.constant 0 : i32
    %c0_i32_0 = arith.constant 0 : i32
    %c0_i32_1 = arith.constant 0 : i32
    return %c0_i32, %c0_i32_0 : i32, i32
  }
  func.func @transform_3(%arg0: i32, %arg1: i32) -> (i32, i32, i32) {
    %c0_i32 = arith.constant 0 : i32
    %c0_i32_0 = arith.constant 0 : i32
    %c0_i32_1 = arith.constant 0 : i32
    return %arg0, %c0_i32, %c0_i32_0 : i32, i32, i32
  }
}

</mosaic_0001>

<bundles_post_ra>
// kernel: tpu_custom_call.1
= control target key start
LH: loop header
LB: loop body
LE: loop exit
PB: predicated region body
PF: predicated region fallthrough
CT: control target
= control target key end

     0   :  { %8 = vsyncpa [#allocation4], 0  ;;  %s709_s0 = inlined_call_operand.vmem [shape: f32[16,20], index: 0, kind: input, shape index: {}]   ;;  %s710_s1 = inlined_call_operand.vmem [shape: s32[16,1], index: 1, kind: input, shape index: {}]   ;;  %s711_s2 = inlined_call_operand.vmem [shape: f32[1,20], index: 2, kind: input, shape index: {}]   ;;  %s712_s3 = inlined_call_operand.hbm [shape: f32[2,8,128], index: 3, kind: output, shape index: {}]  }
   0x1   :  { %10 = vsyncpa [#allocation4 + $0x1], 0  ;;  %s585_s12 = smov 0   ;;  %s587_s13 = smov 0  }
   0x2   :  { %s589_s14 = smov 0   ;;  %s591_s15 = smov 0  }
   0x3   :  { %s593_s16 = smov 0   ;;  %s595_s17 = smov 0  }
   0x4 LB: > { %s406_s18 = sadd.s32 4294967295, %s560_s17   ;;  %s407_s19 = sadd.s32 4294967294, %s560_s17   ;;  %s560_s17 = sphi %s595_s17, %s16_s17   ;;  %s556_s16 = sphi %s593_s16, %s719_s16   ;;  %s552_s15 = sphi %s591_s15, %s718_s15   ;;  %s548_s14 = sphi %s589_s14, %s717_s14   ;;  %s544_s13 = sphi %s587_s13, %s716_s13   ;;  %s540_s12 = sphi %s585_s12, %s715_s12  }
   0x5   : > { %s28_s20 = sadd.s32 1, %s556_s16  ;;  %s120_s21 = sadd.s32 1, %s548_s14 }
   0x6   : > { %p30_p0 = scmp.ge.s32.totalorder %s28_s20, 2  ;;  %p130_p1 = scmp.ne.s32.totalorder %s548_s14, %s544_s13 }
   0x7   : > { %p131_p2 = scmp.eq.s32.totalorder %s406_s18, 1  ;;  %p136_p3 = scmp.ne.s32.totalorder %s544_s13, %s540_s12 }
   0x8   : > { %s721_s20 = smov (%p30_p0, %s28_s20), 0  ;;  %p137_p5 = scmp.eq.s32.totalorder %s407_s19, 1 }
   0x9   : > { %p625_p4 = por %p131_p2, %p130_p1  ;;  %s117_s23 = ssub.s32 %s556_s16, %s721_s20 }
   0xa   : > { %p410_p6 = scmp.ge.s32.totalorder %s560_s17, 1  ;;  %p118_p7 = scmp.eq.s32.totalorder %s117_s23, 0 }
   0xb   : > { %p632_p8 = por %p137_p5, %p136_p3  ;;  %p188_p9 = scmp.lt.s32.totalorder %s560_s17, 3 }
   0xc   : > { %s638_s25 = scalar_select %p118_p7, %s548_s14, %s120_s21  }
   0xd   : > { %p189_p10 = pnand %p410_p6, %p188_p9 }
   0xe   : > { %p224_p11 = scmp.lt.s32.totalorder (!%p189_p10), %s552_s15, 0  ;;  %v562_v0 = vmov (!%p189_p10), 0   ;;  %vm251_vm0 = vcmask (!%p189_p10), 162816   ;;  %v563_v3 = vmov (!%p189_p10), 0.0   ;;  %v257_v4 = vlaneseq (!%p189_p10)  ;;  %s416_s5 = sshll.u32 (!%p189_p10), %s552_s15, 4 }
   0xf   : > { %192 = sbr.rel (%p189_p10) target bundleno = 403 (0x193), region = 32  ;;  %481 = vset.pattern.permute.xlu0 (!%p189_p10), %v562_v0  ;;  %252 = vst.msk [vmem:[#allocation2] sm:$0xff] (!%p189_p10), %vm251_vm0, %v563_v3  ;;  %v272_v6 = vstv (!%p189_p10), %s416_s5  ;;  %v417_v22 = vld [vmem:[%s711_s2] ss:$0 sm:$0xff] (!%p189_p10)  ;;  %s220_s11 = sand.u32 (!%p189_p10), 1, %s544_s13  }
  0x10   : > { %v260_v5 = vshrl.u32 (!%p189_p10), %v257_v4, 7  ;;  %v258_v9 = vand.u32 (!%p189_p10), 127, %v257_v4  ;;  %s411_s18 = sshll.u32 (!%p189_p10), %s220_s11, 3  ;;  %s419_s23 = sshll.u32 (!%p189_p10), %s552_s15, 7 }
  0x11   : > { %s222_s19 = scalar_lea.vmem (!%p189_p10), [#allocation3], %s411_s18  ;;  %s662_s30 = scalar_lea.hbm (!%p189_p10), %s712_s3, %s419_s23 }
  0x12   : > { %v273_v7 = vadd.s32 (!%p189_p10), %v272_v6, %v260_v5  ;;  %v261_v8 = vadd.s32 (!%p189_p10), 8, %v260_v5  ;;  %s327_s21 = sshll.u32 (!%p189_p10), %s222_s19, 4  ;;  %s664_s21 = int_to_ptr.vmem [resolvable:$true] %s327_s21 }
  0x13   : > { %s482_s5 = scalar_lea.vmem (!%p189_p10), %s664_s21, 128 }
  0x14   : > { %vm275_vm1 = vcmp.lt.s32.totalorder (!%p189_p10), %v273_v7, 16  ;;  %v274_v10 = vadd.s32 (!%p189_p10), %v272_v6, %v261_v8  ;;  %p483_p13 = scmp.ne.s32.totalorder (!%p189_p10), %s664_s21, %s482_s5 }
  0x16   : > { %s225_s26 = scalar_select %p224_p11, %s552_s15, 0  ;;  %vm276_vm4 = vcmp.lt.s32.totalorder %v274_v10, 16  ;;  %v281_v18 = vld [vmem:[#allocation2] sm:$0xff] }
  0x17   : > { %p484_p0 = pnand %p483_p13, %p625_p4  ;;  %s564_s15 = smov [#allocation3]  }
  0x18   : > { %s412_s27 = sshll.u32 %s225_s26, 1  ;;  %s486_s6 = sshll.u32 %s564_s15, 4  ;;  %s487_s6 = int_to_ptr.vmem [resolvable:$false] %s486_s6 }
  0x19   : > { %p227_p12 = scmp.lt.s32.totalorder %s412_s27, 1  ;;  %p485_p1 = pneg %p484_p0 }
  0x1a   : > { %s488_s7 = scalar_lea.vmem %s487_s6, 256  ;;  %p489_p2 = scmp.lt.s32.totalorder %s664_s21, %s487_s6 }
  0x1b   : > { %s723_s27 = smov (!%p227_p12, %s412_s27), 1  ;;  %p490_p3 = scmp.lt.s32.totalorder %s488_s7, %s482_s5 }
  0x1c   : > { %s413_s28 = sshll.u32 %s723_s27, 3 }
  0x1d   : > { %s242_s4 = scalar_lea.vmem %s710_s1, %s413_s28  ;;  %s230_s8 = scalar_lea.vmem %s709_s0, %s413_s28 }
  0x1e   : > { %v255_v1 = vld [vmem:[%s242_s4] sm:$0xff]  ;;  %v256_v2 = vld [vmem:[%s242_s4 + $0x8] sm:$0xff]  ;;  %s314_s4 = scalar_lea.sflag [#allocation4], %s220_s11  ;;  %p491_p5 = por %p490_p3, %p489_p2 }
  0x1f   : > { %265 = vperm.xlu0 %481, %v255_v1   ;;  %v253_v12 = vld [vmem:[%s230_s8] sm:$0xff]  ;;  %v254_v14 = vld [vmem:[%s230_s8 + $0x8] sm:$0xff] }
  0x20   : > { %p492_p6 = pnand %p491_p5, %p485_p1 }
  0x23   : > { %268 = vperm.xlu0 %481, %v256_v2  }
  0x9e   : > { %v266_v11 = vpop.permute.xlu0 %265 }
  0x9f   : > { %vm270_vm2 = vcmp.eq.s32.totalorder %v258_v9, %v266_v11 }
  0xa0   : > { %vm277_vm3 = vmand %vm270_vm2, %vm275_vm1 }
  0xa1   : > { %v279_v15 = vsel %vm277_vm3, %v253_v12, 0.0 }
  0xa2   : > { %v269_v13 = vpop.permute.xlu0 %268  ;;  %v283_v17 = vsel %vm251_vm0, %v279_v15, 0.0 }
  0xa3   : > { %vm271_vm5 = vcmp.eq.s32.totalorder %v258_v9, %v269_v13 }
  0xa4   : > { %vm278_vm6 = vmand %vm271_vm5, %vm276_vm4 }
  0xa5   : > { %v280_v16 = vsel %vm278_vm6, %v254_v14, 0.0 }
  0xa6   : > { %v284_v19 = vsel %vm251_vm0, %v280_v16, 0.0 }
  0xa7   : > { %v285_v20 = vadd.f32 %v284_v19, %v283_v17 }
  0xa9   : > { %v286_v21 = vadd.f32 %v285_v20, %v281_v18 }
  0xab   : > { %287 = vst.msk [vmem:[#allocation2] sm:$0xff] %vm251_vm0, %v286_v21 }
  0xb2   : > { %v291_v23 = vld [vmem:[#allocation2] sm:$0xff] }
  0xb3   : > { %v299_v24 = vmul.f32 %v417_v22, %v291_v23 }
  0xb5   : > { %v300_v25 = vsel %vm251_vm0, %v299_v24, 0.0 }
  0xb6   : > { %301 = vadd.xlane.f32.xlu1 %v300_v25 }
 0x143   : > { %v302_v26 = vpop.xlane.xlu1 %301 }
 0x144   : > { %v303_v27 = vrot.slane %v302_v26, 4 }
 0x146   : > { %v304_v28 = vadd.f32 %v303_v27, %v302_v26 }
 0x148   : > { %v305_v29 = vrot.slane %v304_v28, 2 }
 0x14a   : > { %v306_v30 = vadd.f32 %v305_v29, %v304_v28 }
 0x14c   : > { %v307_v31 = vrot.slane %v306_v30, 1 }
 0x14e   : > { %v308_v32 = vadd.f32 %v307_v31, %v306_v30 }
 0x150   : > { %422 = vpush %v308_v32 }
 0x181   : > { %s423_s26 = spop %422 }
 0x182   : > { %s310_s27 = ssub.f32 0.0, %s423_s26 }
 0x184   : > { %v311_v33 = vstv %s310_s27 }
 0x185   : > { %312 = vst [vmem:[%s222_s19] sm:$0xff] %v311_v33 }
 0x186   : > { %495 = shalt.err (!%p492_p6)
}
 0x187   : > { %s496_s8 = scalar_lea.hbm %s662_s30, 128  ;;  %s500_s11 = scalar_lea.hbm %s712_s3, 256 }
 0x188   : > { %p497_p7 = scmp.ne.s32.totalorder %s662_s30, %s496_s8  ;;  %p501_p11 = scmp.lt.u32.totalorder %s662_s30, %s712_s3 }
 0x189   : > { %p502_p12 = scmp.lt.u32.totalorder %s500_s11, %s496_s8  ;;  %p504_p0 = scmp.lt.u32.totalorder %s496_s8, %s662_s30 }
 0x18a   : > { %p498_p9 = pnand %p497_p7, %p625_p4 }
 0x18b   : > { %p503_p13 = por %p502_p12, %p501_p11 }
 0x18c   : > { %p499_p10 = pneg %p498_p9 }
 0x18d   : > { %p505_p1 = por %p504_p0, %p503_p13 }
 0x18f   : > { %p506_p2 = pnand %p505_p1, %p499_p10 }
 0x191   : > { %509 = shalt.err (!%p506_p2)
}
 0x192   : > { %424 = dma.vmem_to_hbm [thread:$0]  (%p625_p4), %s664_s21, 128, %s662_s30, %s314_s4  }
 0x193 PF: > { %p430_p3 = scmp.ge.s32.totalorder %s560_s17, 2  ;;  %s339_s23 = sand.u32 1, %s540_s12  }
 0x194   : > { %s340_s26 = scalar_lea.sflag [#allocation4], %s339_s23 }
 0x195   : > { %p427_p5 = pnand %p430_p3, %p632_p8 }
 0x197   : > { %535 = dma.done.wait (!%p427_p5), %s340_s26, 128  }
 0x198   : > { %537 = vsyncadd (!%p427_p5), %s340_s26, 4294967168  ;;  %s16_s17 = sadd.s32 1, %s560_s17   ;;  %s715_s12 = smov %s544_s13 }
 0x199   : > { %p13_p6 = scmp.ge.s32.totalorder %s16_s17, 4   ;;  %s716_s13 = smov %s548_s14 }
 0x19a   : > { %s717_s14 = smov %s638_s25  ;;  %s718_s15 = smov %s556_s16 }
 0x19b   : > { %s719_s16 = smov %s721_s20  ;;  %15 = sbr.rel (!%p13_p6) target bundleno = 4 (0x4), region = 78 }
 0x1a2   :  { %345 = vsyncpa [#allocation4], 1 }
 0x1a3   :  { %347 = vsyncpa [#allocation4 + $0x1], 1 }

</bundles_post_ra>
